<compile_context>
chip_gen: v6e
topology: v6e:2x2x1
jax: 0.10.0
libtpu: 0.0.40
codegen_flags: <defaults>
</compile_context>

<pallas_src>
import functools

import jax
import jax.numpy as jnp
from jax.experimental import pallas as pl
from jax.experimental.pallas import tpu as pltpu

EPS = 1e-5  # nn.LayerNorm default


def _round_up(a: int, b: int) -> int:
    return (a + b - 1) // b * b


def _vmem_budget_bytes() -> int:
    """Generation-aware VMEM limit: leave headroom on v7x (64 MiB physical)."""
    try:
        kind = jax.devices()[0].device_kind.lower()
    except Exception:  # pragma: no cover - defensive
        kind = ""
    if "v7" in kind:
        return 48 * 1024 * 1024
    return 96 * 1024 * 1024  # v5e / v6e (128 MiB physical)


def _pick_tm(M: int, fits) -> int | None:
    """Token-tile height: multiple of 8, least pad waste, largest on ties,
    must fit the VMEM budget; keep >=2 token tiles when M allows (v7x has
    2 TensorCores sharing the parallel grid axis; neutral on 1-TC chips)."""
    cap = _round_up(M if M <= 8 else -(-M // 2), 8)
    cands = [c for c in (1024, 512, 256, 128) if c <= cap]
    if not cands:
        cands = [_round_up(min(M, cap), 8)]
    cands = [c for c in cands if fits(c)]
    if not cands:
        return None
    return min(cands, key=lambda c: (_round_up(M, c) - M, -c))


def _layernorm(x_raw, gamma, beta, d_true):
    """f32 LayerNorm over the last axis.  Padded feature columns (index >=
    d_true) must already be zero in x_raw (wrapper zero-pads), so the mean
    needs no mask; only the centered values are masked before the variance."""
    d_pad = x_raw.shape[-1]
    x = x_raw.astype(jnp.float32)
    inv_d = jnp.float32(1.0 / d_true)
    mean = jnp.sum(x, axis=-1, keepdims=True) * inv_d
    centered = x - mean
    if d_pad != d_true:  # static: only emitted when D was padded
        mask = (jax.lax.broadcasted_iota(jnp.int32, (1, d_pad), 1)
                < d_true).astype(jnp.float32)
        centered = centered * mask  # padded cols would otherwise equal -mean
    var = jnp.sum(centered * centered, axis=-1, keepdims=True) * inv_d
    xn = centered * jax.lax.rsqrt(var + EPS)
    return xn * gamma.astype(jnp.float32) + beta.astype(jnp.float32)


def prenorm_resident_kernel(x_ref, g_ref, b_ref, w_ref, wb_ref, o_ref, *, d_true):
    # 1-D grid over token tiles.  Params (gamma/beta/weight/bias) have constant
    # index maps, so they are DMA'd into VMEM once and never re-streamed.
    # x_ref: (tm, Dp)  w_ref: (Dp, Hp) bf16  wb_ref: (1, Hp)  o_ref: (tm, Hp)
    y = _layernorm(x_ref[...], g_ref[...], b_ref[...], d_true)
    acc = jnp.dot(y.astype(jnp.bfloat16), w_ref[...],
                  preferred_element_type=jnp.float32)
    o_ref[...] = (acc + wb_ref[...].astype(jnp.float32)).astype(o_ref.dtype)


def prenorm_tiled_kernel(x_ref, g_ref, b_ref, w_ref, wb_ref, o_ref, y_ref, *, d_true):
    # 2-D fallback grid (token tiles x H tiles) for weights too large to be
    # VMEM-resident.  LN is computed once per token tile at j == 0 and cached.
    @pl.when(pl.program_id(1) == 0)
    def _():
        y = _layernorm(x_ref[...], g_ref[...], b_ref[...], d_true)
        y_ref[...] = y.astype(y_ref.dtype)  # bf16 MXU operand

    acc = jnp.dot(y_ref[...], w_ref[...], preferred_element_type=jnp.float32)
    # TODO(synk): per review, a constant-index (1, Hp) bias block sliced with
    # pl.ds(j*tn, tn) would remove the tiny per-step bias DMA; kept j-indexed
    # here for lowering portability (micro-win only on this fallback path).
    o_ref[...] = (acc + wb_ref[...].astype(jnp.float32)).astype(o_ref.dtype)


def prenorm_linear(x, gamma, beta, w, wb, *, force_tiled=False):
    """PreNorm(dim, fn=Linear(dim, hidden)) forward.  x: (B, N, D) -> (B, N, H)."""
    B, N, D = x.shape
    H = w.shape[1]
    M = B * N
    out_dtype = x.dtype
    x_isz = jnp.dtype(x.dtype).itemsize
    o_isz = jnp.dtype(out_dtype).itemsize

    Dp = _round_up(D, 128)
    Hp = _round_up(H, 128)
    budget = _vmem_budget_bytes()
    usable = int(budget * 0.85)

    w_bytes = Dp * Hp * 2                       # bf16 resident weight
    param_bytes = 2 * (2 * Dp * 4 + Hp * 4)     # gamma/beta/bias (budget x2)

    # ---------- plan: weight-resident 1-D grid (preferred) ----------
    def fits_resident(tm_):
        return (2 * tm_ * Dp * x_isz            # x tile, double-buffered
                + 2 * tm_ * Hp * o_isz          # out tile, double-buffered
                + 2 * w_bytes + param_bytes) <= usable

    tm = None if force_tiled else _pick_tm(M, fits_resident)
    resident = tm is not None

    # ---------- plan: 2-D tiled fallback ----------
    if not resident:
        if Hp % 512 == 0:
            tn = 512
        elif Hp % 256 == 0:
            tn = 256
        else:
            tn = 128  # Hp is always a multiple of 128

        def fits_tiled(tm_):
            return (2 * tm_ * Dp * x_isz
                    + 2 * tm_ * tn * o_isz
                    + 2 * Dp * tn * 2           # weight tile, double-buffered
                    + tm_ * Dp * 2              # y scratch (bf16)
                    + 2 * (2 * Dp * 4 + tn * 4)) <= usable

        tm = _pick_tm(M, fits_tiled)
        if tm is None:
            tm = _round_up(min(M, 128), 8)

    Mp = _round_up(M, tm)

    # ---------- pad operands (skip copies when nothing to pad) ----------
    x2 = x.reshape(M, D)
    if (Mp, Dp) != (M, D):
        x2 = jnp.pad(x2, ((0, Mp - M), (0, Dp - D)))
    g2 = gamma.astype(jnp.float32)
    b2 = beta.astype(jnp.float32)
    if Dp != D:
        g2 = jnp.pad(g2, (0, Dp - D))
        b2 = jnp.pad(b2, (0, Dp - D))
    g2 = g2.reshape(1, Dp)
    b2 = b2.reshape(1, Dp)
    w2 = w.astype(jnp.bfloat16)
    if (Dp, Hp) != (D, H):
        w2 = jnp.pad(w2, ((0, Dp - D), (0, Hp - H)))
    wb2 = wb.astype(jnp.float32)
    if Hp != H:
        wb2 = jnp.pad(wb2, (0, Hp - H))
    wb2 = wb2.reshape(1, Hp)

    if resident:
        kernel = functools.partial(prenorm_resident_kernel, d_true=D)
        out = pl.pallas_call(
            kernel,
            out_shape=jax.ShapeDtypeStruct((Mp, Hp), out_dtype),
            grid_spec=pltpu.PrefetchScalarGridSpec(
                num_scalar_prefetch=0,
                grid=(Mp // tm,),
                in_specs=[
                    pl.BlockSpec((tm, Dp), lambda i: (i, 0)),   # x token tile
                    pl.BlockSpec((1, Dp), lambda i: (0, 0)),    # gamma (resident)
                    pl.BlockSpec((1, Dp), lambda i: (0, 0)),    # beta  (resident)
                    pl.BlockSpec((Dp, Hp), lambda i: (0, 0)),   # full weight
                    pl.BlockSpec((1, Hp), lambda i: (0, 0)),    # full bias
                ],
                out_specs=pl.BlockSpec((tm, Hp), lambda i: (i, 0)),
            ),
            compiler_params=pltpu.CompilerParams(
                dimension_semantics=("parallel",),
                vmem_limit_bytes=budget,
            ),
        )(x2, g2, b2, w2, wb2)
    else:
        kernel = functools.partial(prenorm_tiled_kernel, d_true=D)
        out = pl.pallas_call(
            kernel,
            out_shape=jax.ShapeDtypeStruct((Mp, Hp), out_dtype),
            grid_spec=pltpu.PrefetchScalarGridSpec(
                num_scalar_prefetch=0,
                grid=(Mp // tm, Hp // tn),
                in_specs=[
                    pl.BlockSpec((tm, Dp), lambda i, j: (i, 0)),   # x token tile
                    pl.BlockSpec((1, Dp), lambda i, j: (0, 0)),    # gamma
                    pl.BlockSpec((1, Dp), lambda i, j: (0, 0)),    # beta
                    pl.BlockSpec((Dp, tn), lambda i, j: (0, j)),   # weight tile
                    pl.BlockSpec((1, tn), lambda i, j: (0, j)),    # bias tile
                ],
                out_specs=pl.BlockSpec((tm, tn), lambda i, j: (i, j)),
                scratch_shapes=[pltpu.VMEM((tm, Dp), jnp.bfloat16)],  # cached LN
            ),
            compiler_params=pltpu.CompilerParams(
                dimension_semantics=("parallel", "arbitrary"),
                vmem_limit_bytes=budget,
            ),
        )(x2, g2, b2, w2, wb2)

    return out[:M, :H].reshape(B, N, H)


def prenorm_ref(x, gamma, beta, w, wb):
    xf = x.astype(jnp.float32)
    mean = jnp.mean(xf, axis=-1, keepdims=True)
    var = jnp.mean((xf - mean) ** 2, axis=-1, keepdims=True)
    y = (xf - mean) * jax.lax.rsqrt(var + EPS) * gamma + beta
    return (y @ w + wb).astype(x.dtype)


if __name__ == "__main__":
    # Small ViT-like shapes.  D=96 exercises the feature-dim padding (-> 128),
    # H=192 the output padding (-> 256); M=16 gives 2 token tiles so both v7x
    # TensorCores get work.
    B, N, D, H = 2, 8, 96, 192
    key = jax.random.PRNGKey(0)
    kx, kg, kb, kw, kwb = jax.random.split(key, 5)

    x = jax.random.normal(kx, (B, N, D), dtype=jnp.float32)
    gamma = 1.0 + 0.1 * jax.random.normal(kg, (D,), jnp.float32)
    beta = 0.1 * jax.random.normal(kb, (D,), jnp.float32)
    w = jax.random.normal(kw, (D, H), dtype=jnp.float32) * 0.05
    wb = 0.1 * jax.random.normal(kwb, (H,), jnp.float32)

    ref = prenorm_ref(x, gamma, beta, w, wb)

    # Primary path: weight fully VMEM-resident, 1-D token grid.
    out = prenorm_linear(x, gamma, beta, w, wb)
    jax.block_until_ready(out)
    assert out.shape == (B, N, H)
    # bf16 matmul operands (f32 accumulator) => loosened tolerance vs f32 ref.
    assert jnp.allclose(out, ref, atol=3e-2, rtol=3e-2), float(
        jnp.max(jnp.abs(out - ref)))

    # Fallback path (weight too large to be resident), forced for coverage.
    out_t = prenorm_linear(x, gamma, beta, w, wb, force_tiled=True)
    jax.block_until_ready(out_t)
    assert jnp.allclose(out_t, ref, atol=3e-2, rtol=3e-2), float(
        jnp.max(jnp.abs(out_t - ref)))

    print("KERNEL_OK")
</pallas_src>

<mosaic_0001>
module attributes {stable_mosaic.version = 11 : i64} {
  func.func @prenorm_resident_kernel(%arg0: i32, %arg1: memref<8x128xf32, #tpu.memory_space<vmem>>, %arg2: memref<1x128xf32, #tpu.memory_space<vmem>>, %arg3: memref<1x128xf32, #tpu.memory_space<vmem>>, %arg4: memref<128x256xbf16, #tpu.memory_space<vmem>>, %arg5: memref<1x256xf32, #tpu.memory_space<vmem>>, %arg6: memref<8x256xf32, #tpu.memory_space<vmem>>) attributes {dimension_semantics = [#tpu.dimension_semantics<parallel>], iteration_bounds = array<i64: 2>, scalar_prefetch = 0 : i64, scratch_operands = 0 : i64, tpu.core_type = #tpu.core_type<tc>, window_params = [{transform_indices = @transform_0, window_bounds = array<i64: 8, 128>}, {pipeline_mode = #tpu.pipeline_mode<synchronous>, transform_indices = @transform_1, window_bounds = array<i64: 1, 128>}, {pipeline_mode = #tpu.pipeline_mode<synchronous>, transform_indices = @transform_2, window_bounds = array<i64: 1, 128>}, {pipeline_mode = #tpu.pipeline_mode<synchronous>, transform_indices = @transform_3, window_bounds = array<i64: 128, 256>}, {pipeline_mode = #tpu.pipeline_mode<synchronous>, transform_indices = @transform_4, window_bounds = array<i64: 1, 256>}, {transform_indices = @transform_5, window_bounds = array<i64: 8, 256>}]} {
    %c0 = arith.constant 0 : index
    %c0_0 = arith.constant 0 : index
    %0 = vector.load %arg1[%c0, %c0_0] : memref<8x128xf32, #tpu.memory_space<vmem>>, vector<8x128xf32>
    %c0_1 = arith.constant 0 : index
    %c0_2 = arith.constant 0 : index
    %1 = vector.load %arg2[%c0_1, %c0_2] : memref<1x128xf32, #tpu.memory_space<vmem>>, vector<1x128xf32>
    %c0_3 = arith.constant 0 : index
    %c0_4 = arith.constant 0 : index
    %2 = vector.load %arg3[%c0_3, %c0_4] : memref<1x128xf32, #tpu.memory_space<vmem>>, vector<1x128xf32>
    %cst = arith.constant dense<0.000000e+00> : vector<8xf32>
    %3 = vector.multi_reduction <add>, %0, %cst [1] : vector<8x128xf32> to vector<8xf32>
    %4 = vector.shape_cast %3 : vector<8xf32> to vector<8x1xf32>
    %cst_5 = arith.constant 0.010416667 : f32
    %5 = vector.broadcast %cst_5 : f32 to vector<8x1xf32>
    %6 = arith.mulf %4, %5 : vector<8x1xf32>
    %7 = vector.broadcast %6 : vector<8x1xf32> to vector<8x128xf32>
    %8 = arith.subf %0, %7 : vector<8x128xf32>
    %9 = tpu.iota {dimensions = array<i32: 1>} : vector<1x128xi32>
    %c96_i32 = arith.constant 96 : i32
    %10 = vector.broadcast %c96_i32 : i32 to vector<1x128xi32>
    %11 = arith.cmpi slt, %9, %10 : vector<1x128xi32>
    %12 = arith.extui %11 : vector<1x128xi1> to vector<1x128xi32>
    %13 = arith.sitofp %12 : vector<1x128xi32> to vector<1x128xf32>
    %14 = vector.broadcast %13 : vector<1x128xf32> to vector<8x128xf32>
    %15 = arith.mulf %8, %14 : vector<8x128xf32>
    %16 = arith.mulf %15, %15 : vector<8x128xf32>
    %cst_6 = arith.constant dense<0.000000e+00> : vector<8xf32>
    %17 = vector.multi_reduction <add>, %16, %cst_6 [1] : vector<8x128xf32> to vector<8xf32>
    %18 = vector.shape_cast %17 : vector<8xf32> to vector<8x1xf32>
    %cst_7 = arith.constant 0.010416667 : f32
    %19 = vector.broadcast %cst_7 : f32 to vector<8x1xf32>
    %20 = arith.mulf %18, %19 : vector<8x1xf32>
    %cst_8 = arith.constant 9.99999974E-6 : f32
    %21 = vector.broadcast %cst_8 : f32 to vector<8x1xf32>
    %22 = arith.addf %20, %21 : vector<8x1xf32>
    %23 = math.rsqrt %22 : vector<8x1xf32>
    %24 = vector.broadcast %23 : vector<8x1xf32> to vector<8x128xf32>
    %25 = arith.mulf %15, %24 : vector<8x128xf32>
    %26 = vector.broadcast %1 : vector<1x128xf32> to vector<8x128xf32>
    %27 = arith.mulf %25, %26 : vector<8x128xf32>
    %28 = vector.broadcast %2 : vector<1x128xf32> to vector<8x128xf32>
    %29 = arith.addf %27, %28 : vector<8x128xf32>
    %30 = arith.truncf %29 : vector<8x128xf32> to vector<8x128xbf16>
    %c0_9 = arith.constant 0 : index
    %c0_10 = arith.constant 0 : index
    %31 = vector.load %arg4[%c0_9, %c0_10] : memref<128x256xbf16, #tpu.memory_space<vmem>>, vector<128x256xbf16>
    %cst_11 = arith.constant dense<0.000000e+00> : vector<8x256xf32>
    %32 = tpu.matmul %30, %31, %cst_11 {dimension_numbers = #tpu.dot_dimension_numbers<[1], [0], [0], [1], [0, 0, 1, 1], [], []>} : vector<8x128xbf16>, vector<128x256xbf16>, vector<8x256xf32> -> vector<8x256xf32>
    %c0_12 = arith.constant 0 : index
    %c0_13 = arith.constant 0 : index
    %33 = vector.load %arg5[%c0_12, %c0_13] : memref<1x256xf32, #tpu.memory_space<vmem>>, vector<1x256xf32>
    %34 = vector.broadcast %33 : vector<1x256xf32> to vector<8x256xf32>
    %35 = arith.addf %32, %34 : vector<8x256xf32>
    %c0_14 = arith.constant 0 : index
    %c0_15 = arith.constant 0 : index
    %36 = vector.load %arg6[%c0_14, %c0_15] : memref<8x256xf32, #tpu.memory_space<vmem>>, vector<8x256xf32>
    tpu.vector_store %arg6[%c0_14, %c0_15], %35 {strides = array<i32>} : memref<8x256xf32, #tpu.memory_space<vmem>>, vector<8x256xf32>,
    return
  }
  func.func @transform_0(%arg0: i32) -> (i32, i32) {
    %c0_i32 = arith.constant 0 : i32
    %c0_i32_0 = arith.constant 0 : i32
    return %arg0, %c0_i32 : i32, i32
  }
  func.func @transform_1(%arg0: i32) -> (i32, i32) {
    %c0_i32 = arith.constant 0 : i32
    %c0_i32_0 = arith.constant 0 : i32
    %c0_i32_1 = arith.constant 0 : i32
    return %c0_i32, %c0_i32_0 : i32, i32
  }
  func.func @transform_2(%arg0: i32) -> (i32, i32) {
    %c0_i32 = arith.constant 0 : i32
    %c0_i32_0 = arith.constant 0 : i32
    %c0_i32_1 = arith.constant 0 : i32
    return %c0_i32, %c0_i32_0 : i32, i32
  }
  func.func @transform_3(%arg0: i32) -> (i32, i32) {
    %c0_i32 = arith.constant 0 : i32
    %c0_i32_0 = arith.constant 0 : i32
    %c0_i32_1 = arith.constant 0 : i32
    return %c0_i32, %c0_i32_0 : i32, i32
  }
  func.func @transform_4(%arg0: i32) -> (i32, i32) {
    %c0_i32 = arith.constant 0 : i32
    %c0_i32_0 = arith.constant 0 : i32
    %c0_i32_1 = arith.constant 0 : i32
    return %c0_i32, %c0_i32_0 : i32, i32
  }
  func.func @transform_5(%arg0: i32) -> (i32, i32) {
    %c0_i32 = arith.constant 0 : i32
    %c0_i32_0 = arith.constant 0 : i32
    return %arg0, %c0_i32 : i32, i32
  }
}

</mosaic_0001>

<bundles_post_ra>
// kernel: tpu_custom_call.1
= control target key start
LH: loop header
LB: loop body
LE: loop exit
PB: predicated region body
PF: predicated region fallthrough
CT: control target
= control target key end

     0   :  { %10 = vsyncpa [#allocation3], 0  ;;  %s1064_s0 = inlined_call_operand.hbm [shape: f32[16,128], index: 0, kind: input, shape index: {}]   ;;  %s1065_s1 = inlined_call_operand.vmem [shape: f32[1,128], index: 1, kind: input, shape index: {}]   ;;  %s1066_s2 = inlined_call_operand.hbm [shape: f32[1,128], index: 2, kind: input, shape index: {}]   ;;  %s1067_s3 = inlined_call_operand.hbm [shape: bf16[128,256], index: 3, kind: input, shape index: {}]   ;;  %s1068_s4 = inlined_call_operand.vmem [shape: f32[1,256], index: 4, kind: input, shape index: {}]   ;;  %s1069_s5 = inlined_call_operand.hbm [shape: f32[16,256], index: 5, kind: output, shape index: {}]  }
   0x1   :  { %12 = vsyncpa [#allocation3 + $0x1], 0 }
   0x2   :  { %13 = vsyncpa [#allocation6], 0 }
   0x3   :  { %14 = vsyncpa [#allocation4], 0 }
   0x4   :  { %16 = vsyncpa [#allocation4 + $0x1], 0  ;;  %s880_s18 = smov 0   ;;  %s882_s19 = smov 0  }
   0x5   :  { %s884_s20 = smov 0   ;;  %s886_s21 = smov 0  }
   0x6 LB: > { %s901_s22 = sadd.s32 4294967295, %s840_s21   ;;  %s558_s23 = sadd.s32 4294967294, %s840_s21   ;;  %s840_s21 = sphi %s886_s21, %s1091_s21   ;;  %s836_s20 = sphi %s884_s20, %s1090_s20   ;;  %s832_s19 = sphi %s882_s19, %s1089_s19   ;;  %s828_s18 = sphi %s880_s18, %s1088_s18  }
   0x7   : > { %p42_p0 = scmp.ne.s32.totalorder %s832_s19, %s828_s18  ;;  %p1070_p1 = scmp.eq.s32.totalorder %s901_s22, 0 }
   0x8   : > { %p156_p3 = scmp.eq.s32.totalorder %s558_s23, 1  ;;  %p559_p5 = scmp.ge.s32.totalorder %s840_s21, 1 }
   0x9   : > { %p910_p4 = por %p1070_p1, %p42_p0  ;;  %p163_p7 = scmp.lt.s32.totalorder %s840_s21, 3 }
   0xa   : > { %p915_p6 = por %p156_p3, %p42_p0  ;;  %s842_s27 = smov [#allocation5]  }
   0xb   : > { %s1074_s24 = scalar_select %p910_p4, 1, 0 }
   0xc   : > { %s1075_s25 = scalar_select %p915_p6, 1, 0 }
   0xd   : > { %p920_p8 = pnand %p559_p5, %p163_p7  ;;  %s179_s28 = sshll.u32 %s842_s27, 4  ;;  %s180_s28 = int_to_ptr.vmem [resolvable:$true] %s179_s28 }
   0xe   : > { %s843_s29 = smov [#allocation7]   ;;  %s703_s7 = scalar_lea.vmem %s180_s28, 16 }
   0xf   : > { %s1076_s26 = scalar_select %p920_p8, 1, 0 }
  0x10   : > { %p607_p10 = pneg %p920_p8  ;;  %s189_s30 = sshll.u32 %s843_s29, 4  ;;  %s190_s30 = int_to_ptr.vmem [resolvable:$true] %s189_s30 }
  0x11   : > { %p704_p13 = scmp.ne.s32.totalorder %s180_s28, %s703_s7  ;;  %s710_s8 = scalar_lea.vmem %s180_s28, 32 }
  0x12   : > { %p929_p11 = pnand %p607_p10, %p1070_p1  ;;  %p711_p5 = scmp.lt.s32.totalorder %s180_s28, %s180_s28 }
  0x13   : > { %p712_p7 = scmp.lt.s32.totalorder %s710_s8, %s703_s7 }
  0x14   : > { %p694_p12 = pneg %p929_p11 }
  0x15   : > { %p713_p9 = por %p712_p7, %p711_p5 }
  0x16   : > { %p706_p0 = pnand %p704_p13, %p694_p12 }
  0x18   : > { %p707_p3 = pneg %p706_p0 }
  0x1a   : > { %p714_p2 = pnand %p713_p9, %p707_p3 }
  0x1c   : > { %717 = shalt.err (!%p714_p2)
}
  0x1d   : > { %610 = dma.hbm_to_vmem [thread:$0]  (!%p929_p11), %s1066_s2, 16, %s180_s28, [#allocation6]  }
  0x1e   : > { %s729_s11 = scalar_lea.vmem %s190_s30, 2048  ;;  %p737_p0 = scmp.lt.s32.totalorder %s190_s30, %s190_s30 }
  0x1f   : > { %p730_p10 = scmp.ne.s32.totalorder %s190_s30, %s729_s11  ;;  %p738_p6 = scmp.lt.s32.totalorder %s729_s11, %s729_s11 }
  0x21   : > { %p732_p1 = pnand %p730_p10, %p694_p12  ;;  %p739_p4 = por %p738_p6, %p737_p0 }
  0x23   : > { %p733_p13 = pneg %p732_p1 }
  0x25   : > { %p740_p8 = pnand %p739_p4, %p733_p13 }
  0x27   : > { %743 = shalt.err (!%p740_p8)
}
  0x28   : > { %s844_s12 = smov 128   ;;  %s845_s13 = smov 8  }
  0x29   : > { %613 = dma.hbm_to_vmem [thread:$0]  (!%p929_p11), %s1067_s3, 2048, %s190_s30, [#allocation6], %s844_s12, %s844_s12, %s845_s13  }
  0x2a   : > { %s952_s16 = sadd.s32 1, %s840_s21   ;;  %s29_s17 = sadd.s32 1, %s836_s20 }
  0x2b   : > { %s26_s23 = ssub.s32 %s840_s21, %s952_s16  ;;  %p36_p1 = scmp.ne.s32.totalorder %s836_s20, %s832_s19 }
  0x2c   : > { %p27_p2 = scmp.eq.s32.totalorder %s26_s23, 0  ;;  %p37_p4 = scmp.eq.s32.totalorder %s840_s21, 0 }
  0x2d   : > { %p1078_p6 = scmp.eq.s32.totalorder %s901_s22, 1  ;;  %p624_p9 = scmp.lt.s32.totalorder %s840_s21, 2 }
  0x2e   : > { %s968_s28 = scalar_select %p27_p2, %s836_s20, %s29_s17  }
  0x2f   : > { %p962_p8 = por %p1078_p6, %p36_p1  ;;  %p38_p12 = por %p37_p4, %p36_p1 }
  0x30   : > { %s206_s29 = sand.u32 1, %s836_s20   ;;  %s564_s30 = sshll.u32 %s840_s21, 7 }
  0x31   : > { %s1079_s27 = scalar_select %p962_p8, 1, 0 }
  0x32   : > { %s563_s6 = sshll.u32 %s206_s29, 3  ;;  %s975_s9 = scalar_lea.hbm %s1064_s0, %s564_s30 }
  0x33   : > { %s210_s10 = scalar_lea.vmem [#allocation2], %s563_s6  ;;  %p977_p11 = pnand %p624_p9, %p38_p12 }
  0x34   : > { %s217_s11 = sshll.u32 %s210_s10, 4  ;;  %s207_s13 = scalar_lea.sflag [#allocation3], %s206_s29  ;;  %s218_s11 = int_to_ptr.vmem [resolvable:$true] %s217_s11 }
  0x35   : > { %s744_s14 = scalar_lea.hbm %s975_s9, 128  ;;  %p746_p5 = pneg %p977_p11 }
  0x36   : > { %p745_p3 = scmp.ne.s32.totalorder %s975_s9, %s744_s14  ;;  %s749_s23 = scalar_lea.hbm %s1064_s0, 256 }
  0x37   : > { %p750_p13 = scmp.lt.s32.totalorder %s975_s9, %s1064_s0  ;;  %p751_p0 = scmp.lt.s32.totalorder %s749_s23, %s744_s14 }
  0x38   : > { %p747_p7 = pnand %p746_p5, %p745_p3 }
  0x39   : > { %p752_p1 = por %p751_p0, %p750_p13 }
  0x3a   : > { %p748_p10 = pneg %p747_p7 }
  0x3c   : > { %p753_p2 = pnand %p752_p1, %p748_p10 }
  0x3e   : > { %756 = shalt.err (!%p753_p2)
}
  0x3f   : > { %s757_s7 = scalar_lea.vmem %s218_s11, 128  ;;  %s846_s29 = smov [#allocation2]  }
  0x40   : > { %p758_p4 = scmp.ne.s32.totalorder %s218_s11, %s757_s7  ;;  %s762_s8 = sshll.u32 %s846_s29, 4  ;;  %s763_s8 = int_to_ptr.vmem [resolvable:$false] %s762_s8 }
  0x41   : > { %s764_s10 = scalar_lea.vmem %s763_s8, 256  ;;  %p765_p12 = scmp.lt.s32.totalorder %s218_s11, %s763_s8 }
  0x42   : > { %p760_p6 = pnand %p758_p4, %p746_p5  ;;  %p766_p3 = scmp.lt.s32.totalorder %s764_s10, %s757_s7 }
  0x44   : > { %p761_p9 = pneg %p760_p6  ;;  %p767_p7 = por %p766_p3, %p765_p12 }
  0x46   : > { %p768_p8 = pnand %p767_p7, %p761_p9 }
  0x48   : > { %771 = shalt.err (!%p768_p8)
}
  0x49   : > { %617 = dma.hbm_to_vmem [thread:$0]  (!%p977_p11), %s975_s9, 128, %s218_s11, %s207_s13  }
  0x4a   : > { %p1081_p10 = scmp.ne.s32.totalorder %s1076_s26, 0 }
  0x4b   : > { %s998_s14 = sand.u32 (!%p1081_p10), 1, %s832_s19   ;;  %p1082_p5 = scmp.ne.s32.totalorder (!%p1081_p10), %s1074_s24, 0 }
  0x4c   : > { %226 = sbr.rel (%p1081_p10) target bundleno = 607 (0x25f), region = 40  ;;  %s566_s15 = sshll.u32 (!%p1081_p10), %s998_s14, 3 }
  0x4d   : > { %s229_s17 = scalar_lea.sflag (!%p1081_p10), [#allocation3], %s998_s14  ;;  %s232_s23 = scalar_lea.vmem (!%p1081_p10), [#allocation2], %s566_s15 }
  0x51   : > { %815 = dma.done.wait (%p1082_p5), %s229_s17, 128  }
  0x52   : > { %817 = vsyncadd (%p1082_p5), %s229_s17, 4294967168  ;;  %p1083_p8 = scmp.eq.s32.totalorder %s901_s22, 0 }
  0x54   : > { %819 = dma.done.wait (%p1083_p8), [#allocation6], 2064   ;;  %p1084_p11 = pmov %p1083_p8 }
  0x55   : > { %v268_v0 = vld [vmem:[%s232_s23] sm:$0xff]  ;;  %v671_v4 = vld [vmem:[#allocation7 + $0x60] ss:$8 sps:$4 sm:$0xff]   ;;  %v275_v5 = vlaneseq  ;;  %v847_v9 = vmov 0.0   ;;  %v848_v21 = vmov 0   ;;  %s569_s9 = sshll.u32 %s998_s14, 4 }
  0x56   : > { %821 = vsyncadd (%p1084_p11), [#allocation6], 4294965232  ;;  %271 = vadd.xlane.f32.xlu0 %v268_v0  ;;  %v666_v1 = vld [vmem:[#allocation7 + $0x74] ss:$8 sps:$4 sm:$0xff]   ;;  %v668_v2 = vld [vmem:[#allocation7 + $0x70] ss:$8 sps:$4 sm:$0xff]   ;;  %443 = vmatprep.mubr.bf16.mxu0 %v848_v21 }
  0x57   : > { %v669_v3 = vld [vmem:[#allocation7 + $0x64] ss:$8 sps:$4 sm:$0xff]   ;;  %411 = vmatprep.subr.bf16.mxu0 %v666_v1  ;;  %v276_v6 = vand.u32 127, %v275_v5  ;;  %v672_v14 = vld [vmem:[#allocation7 + $0x54] ss:$8 sps:$4 sm:$0xff]   ;;  %v322_v37 = vshrl.u32 %v275_v5, 7 }
  0x58   : > { %412 = vmatpush1.bf16.msra.mxu0 %v668_v2  ;;  %v674_v15 = vld [vmem:[#allocation7 + $0x50] ss:$8 sps:$4 sm:$0xff]   ;;  %v675_v16 = vld [vmem:[#allocation7 + $0x44] ss:$8 sps:$4 sm:$0xff]   ;;  %v677_v17 = vld [vmem:[#allocation7 + $0x40] ss:$8 sps:$4 sm:$0xff]  }
  0x59   : > { %413 = vmatprep.subr.bf16.mxu0 %v669_v3  ;;  %vm277_vm0 = vcmp.lt.s32.totalorder %v276_v6, 96  ;;  %v678_v18 = vld [vmem:[#allocation7 + $0x34] ss:$8 sps:$4 sm:$0xff]   ;;  %v680_v19 = vld [vmem:[#allocation7 + $0x30] ss:$8 sps:$4 sm:$0xff]   ;;  %v323_v38 = vsub.s32 0, %v322_v37 }
  0x5a   : > { %v570_v10 = vsel %vm277_vm0, 1.0, %v847_v9  ;;  %v681_v20 = vld [vmem:[#allocation7 + $0x24] ss:$8 sps:$4 sm:$0xff]   ;;  %v683_v22 = vld [vmem:[#allocation7 + $0x20] ss:$8 sps:$4 sm:$0xff]   ;;  %v327_v40 = vsub.s32 1, %v322_v37 }
  0x5b   : > { %v684_v23 = vld [vmem:[#allocation7 + $0x14] ss:$8 sps:$4 sm:$0xff]   ;;  %v686_v24 = vld [vmem:[#allocation7 + $0x10] ss:$8 sps:$4 sm:$0xff]   ;;  %v687_v25 = vld [vmem:[#allocation7 + $0x4] ss:$8 sps:$4 sm:$0xff]  }
  0x5c   : > { %414 = vmatpush1.bf16.msra.mxu0 %v671_v4  ;;  %v689_v26 = vld [vmem:[#allocation7] ss:$8 sps:$4 sm:$0xff]   ;;  %v571_v31 = vld [vmem:[%s1065_s1] ss:$0 sm:$0xff]  ;;  %v572_v33 = vld [vmem:[#allocation5] ss:$0 sm:$0xff] }
  0x5d   : > { %415 = vmatprep.subr.bf16.mxu0 %v672_v14  ;;  %v319_v39 = vld [vmem:[%s1068_s4] sm:$0x3]  ;;  %s594_s13 = sshll.u32 %s901_s22, 8  ;;  %s266_s30 = scalar_lea.vmem [#allocation8], %s569_s9 }
  0x5e   : > { %v324_v41 = vrot.slane %v319_v39, %v323_v38  ;;  %v328_v42 = vrot.slane %v319_v39, %v327_v40  ;;  %s469_s6 = sshll.u32 %s266_s30, 4  ;;  %s1021_s8 = scalar_lea.hbm %s1069_s5, %s594_s13  ;;  %s1023_s6 = int_to_ptr.vmem [resolvable:$true] %s469_s6 }
  0x5f   : > { %s455_s22 = scalar_lea.sflag [#allocation4], %s998_s14  ;;  %s772_s10 = scalar_lea.vmem %s1023_s6, 256 }
  0x60   : > { %416 = vmatpush1.bf16.msra.mxu0 %v674_v15  ;;  %p773_p13 = scmp.ne.s32.totalorder %s1023_s6, %s772_s10  ;;  %p1085_p0 = scmp.ne.s32.totalorder %s1079_s27, 0 }
  0x61   : > { %417 = vmatprep.subr.bf16.mxu0 %v675_v16  ;;  %s849_s15 = smov [#allocation8]  }
  0x62   : > { %p774_p1 = pnand %p773_p13, %p1085_p0  ;;  %s776_s17 = sshll.u32 %s849_s15, 4  ;;  %s777_s17 = int_to_ptr.vmem [resolvable:$false] %s776_s17 }
  0x63   : > { %s778_s23 = scalar_lea.vmem %s777_s17, 512  ;;  %p779_p4 = scmp.lt.s32.totalorder %s1023_s6, %s777_s17 }
  0x64   : > { %418 = vmatpush1.bf16.msra.mxu0 %v677_v17  ;;  %p775_p2 = pneg %p774_p1  ;;  %p780_p6 = scmp.lt.s32.totalorder %s778_s23, %s772_s10 }
  0x65   : > { %419 = vmatprep.subr.bf16.mxu0 %v678_v18 }
  0x66   : > { %p781_p9 = por %p780_p6, %p779_p4 }
  0x68   : > { %420 = vmatpush1.bf16.msra.mxu0 %v680_v19  ;;  %p782_p12 = pnand %p781_p9, %p775_p2 }
  0x69   : > { %421 = vmatprep.subr.bf16.mxu0 %v681_v20 }
  0x6c   : > { %422 = vmatpush1.bf16.msra.mxu0 %v683_v22 }
  0x6d   : > { %423 = vmatprep.subr.bf16.mxu0 %v684_v23 }
  0x70   : > { %424 = vmatpush1.bf16.msra.mxu0 %v686_v24 }
  0x71   : > { %425 = vmatprep.subr.bf16.mxu0 %v687_v25 }
  0x74   : > { %426 = vmatpush1.bf16.msra.mxu0 %v689_v26 }
  0xdf   : > { %v272_v7 = vpop.xlane.xlu0 %271 }
  0xe0   : > { %v273_v8 = vmul.f32 0.010416667, %v272_v7 }
  0xe2   : > { %v274_v11 = vsub.f32 %v268_v0, %v273_v8 }
  0xe4   : > { %v280_v12 = vmul.f32 %v570_v10, %v274_v11 }
  0xe6   : > { %v281_v13 = vmul.f32 %v280_v12, %v280_v12 }
  0xe8   : > { %282 = vadd.xlane.f32.xlu0 %v281_v13 }
 0x171   : > { %v283_v27 = vpop.xlane.xlu0 %282 }
 0x172   : > { %v284_v28 = vmul.f32 0.010416667, %v283_v27 }
 0x174   : > { %v285_v29 = vadd.f32 1e-05, %v284_v28 }
 0x176   : > { %690 = vrsqrt.f32 %v285_v29 }
 0x183   : > { %v691_v30 = vpop.eup %690 }
 0x184   : > { %v287_v32 = vmul.f32 %v691_v30, %v280_v12 }
 0x186   : > { %v294_v34 = vmul.f32 %v571_v31, %v287_v32 }
 0x188   : > { %v301_v35 = vadd.f32 %v572_v33, %v294_v34 }
 0x18a   : > { %v302_v36 = vpack.c.bf16 %v301_v35, %v301_v35 }
 0x18c   : > { %444 = vmatmul.mubr.bf16.vlgmr.msra.gmra.mxu0 %v302_v36 }
 0x24c   : > { %v445_v43 = vpop.f32.mrf.mxu0 }
 0x24d   : > { %v446_v44 = vadd.f32 %v445_v43, %v324_v41 }
 0x24e   : > { %v447_v45 = vpop.f32.mrf.mxu0 }
 0x24f   : > { %452 = vst [vmem:[%s266_s30] sm:$0xff] %v446_v44  ;;  %v448_v46 = vadd.f32 %v447_v45, %v328_v42 }
 0x250   : > { %v449_v47 = vpop.f32.mrf.mxu0 }
 0x251   : > { %453 = vst [vmem:[%s266_s30 + $0x8] sm:$0xff] %v448_v46 }
 0x252   : > { %v450_v48 = vpop.f32.mrf.mxu0 }
 0x253   : > { %785 = shalt.err (!%p782_p12)
}
 0x254   : > { %s786_s24 = scalar_lea.hbm %s1021_s8, 256  ;;  %s790_s9 = scalar_lea.hbm %s1069_s5, 512 }
 0x255   : > { %p787_p3 = scmp.ne.s32.totalorder %s1021_s8, %s786_s24  ;;  %p791_p5 = scmp.lt.s32.totalorder %s1021_s8, %s1069_s5 }
 0x256   : > { %p792_p8 = scmp.lt.s32.totalorder %s790_s9, %s786_s24 }
 0x257   : > { %p788_p7 = pnand %p787_p3, %p1085_p0 }
 0x258   : > { %p793_p11 = por %p792_p8, %p791_p5 }
 0x259   : > { %p789_p10 = pneg %p788_p7 }
 0x25b   : > { %p794_p13 = pnand %p793_p11, %p789_p10 }
 0x25d   : > { %797 = shalt.err (!%p794_p13)
}
 0x25e   : > { %605 = dma.vmem_to_hbm [thread:$0]  (%p1085_p0), %s1023_s6, 256, %s1021_s8, %s455_s22  }
 0x25f PF: > { %s481_s13 = sand.u32 1, %s828_s18   ;;  %p1086_p1 = scmp.ne.s32.totalorder %s1075_s25, 0 }
 0x260   : > { %p1087_p2 = scmp.ge.s32.totalorder %s840_s21, 2  ;;  %s482_s30 = scalar_lea.sflag [#allocation4], %s481_s13 }
 0x262   : > { %p619_p4 = pnand %p1087_p2, %p1086_p1 }
 0x264   : > { %p620_p6 = pneg %p619_p4 }
 0x266   : > { %823 = dma.done.wait (%p620_p6), %s482_s30, 256  }
 0x267   : > { %825 = vsyncadd (%p620_p6), %s482_s30, 4294967040  ;;  %p19_p9 = scmp.ge.s32.totalorder %s952_s16, 4   ;;  %s1088_s18 = smov %s832_s19 }
 0x268   : > { %s1089_s19 = smov %s836_s20  ;;  %s1090_s20 = smov %s968_s28 }
 0x269   : > { %s1091_s21 = smov %s952_s16  ;;  %21 = sbr.rel (!%p19_p9) target bundleno = 6 (0x6), region = 93 }
 0x26e   :  { %487 = vsyncpa [#allocation3], 1 }
 0x26f   :  { %489 = vsyncpa [#allocation3 + $0x1], 1 }
 0x270   :  { %490 = vsyncpa [#allocation6], 1 }
 0x271   :  { %491 = vsyncpa [#allocation4], 1 }
 0x272   :  { %493 = vsyncpa [#allocation4 + $0x1], 1 }

</bundles_post_ra>
